<compile_context>
chip_gen: v7x
topology: tpu7x:2x2x1
jax: 0.10.0
libtpu: 0.0.40
codegen_flags: <defaults>
</compile_context>

<pallas_src>
import jax
import jax.numpy as jnp
from jax.experimental import pallas as pl
from jax.experimental.pallas import tpu as pltpu


def _prod_axis1(t):
    """Product over axis=1 of a (B, F, H) array using a pairwise tree of dense
    elementwise multiplies (avoids relying on multiplicative multi_reduction lowering)."""
    leftovers = []
    while t.shape[1] > 1:
        n = t.shape[1]
        half = n // 2
        if n % 2 == 1:
            leftovers.append(t[:, n - 1, :])
        t = t[:, :half, :] * t[:, half:2 * half, :]
    res = t[:, 0, :]
    for lo in leftovers:
        res = res * lo
    return res


def gcln_cnf_kernel(x_ref, wor_ref, wand_ref, out_ref):
    # x_ref   : (TB, F)    raw variables (literal expansion done in-kernel)
    # wor_ref : (2F, H)    OR-layer weights, columns in k-major order (h' = k*O + i)
    # wand_ref: (1, H)     AND-layer weights, same k-major column order
    # out_ref : (TB, O)
    x = x_ref[...].astype(jnp.float32)                 # (TB, F)
    wor = jnp.clip(wor_ref[...], 0.0, 1.0)             # clamp fused (mirrors clamp_(0,1))
    wand = jnp.clip(wand_ref[...], 0.0, 1.0)           # (1, H)

    TB, F = x.shape
    H = wor.shape[1]
    O = out_ref.shape[1]
    K = H // O

    wp = wor[:F, :]                                    # weights applied to x
    wn = wor[F:, :]                                    # weights applied to (1 - x)

    # ---- OR layer (noisy-OR over literals), lane-dense, chunked over F ----
    # F_CHUNK bounds the (TB, F_CHUNK, H) f32 intermediate so it fits the VMEM budget
    # (keep the chunk small enough for v7x's 64 MiB VMEM at large TB/H).
    F_CHUNK = 128
    acc = jnp.ones((TB, H), dtype=jnp.float32)
    for c0 in range(0, F, F_CHUNK):
        c1 = min(c0 + F_CHUNK, F)
        xe = x[:, c0:c1][:, :, None]                   # (TB, Fc, 1)
        # literal expansion fused: positive literal uses x, negative literal uses 1 - x
        terms = (1.0 - xe * wp[c0:c1][None, :, :]) * \
                (1.0 - (1.0 - xe) * wn[c0:c1][None, :, :])   # (TB, Fc, H)
        acc = acc * _prod_axis1(terms)
    or_res = 1.0 - acc                                 # (TB, H)

    # ---- AND gating + product t-norm over the K clauses of each output ----
    gated = wand * or_res + (1.0 - wand)               # (TB, H), k-major layout
    out = gated[:, :O]
    for k in range(1, K):
        out = out * gated[:, k * O:(k + 1) * O]        # contiguous lane-slab multiplies
    out_ref[...] = out.astype(out_ref.dtype)           # single full-block store


def gcln_cnf_arch3_forward(x, w_or, w_and, output_size):
    """x: (B, nvars); w_or: (2*nvars, K*output_size); w_and: (K*output_size, 1)."""
    B, F = x.shape
    H = w_or.shape[1]
    O = output_size
    K = H // O

    # One-time layout plumbing (could be folded into parameter storage): permute the hidden
    # axis from clause-major (h = i*K + k) to k-major (h' = k*O + i) so the in-kernel
    # K-product works on contiguous lane slabs instead of strided gathers.
    w_or_r = w_or.reshape(2 * F, O, K).transpose(0, 2, 1).reshape(2 * F, H)
    w_and_r = w_and.reshape(O, K).T.reshape(1, H)

    # Batch tile: biggest power-of-two tile (<=256) that divides B, else the full batch.
    TB = B
    for cand in (256, 128, 64, 32, 16, 8):
        if B % cand == 0:
            TB = cand
            break
    grid = (B // TB,)

    return pl.pallas_call(
        gcln_cnf_kernel,
        out_shape=jax.ShapeDtypeStruct((B, O), x.dtype),
        grid=grid,
        in_specs=[
            pl.BlockSpec((TB, F), lambda b: (b, 0)),
            pl.BlockSpec((2 * F, H), lambda b: (0, 0)),
            pl.BlockSpec((1, H), lambda b: (0, 0)),
        ],
        out_specs=pl.BlockSpec((TB, O), lambda b: (b, 0)),
        compiler_params=pltpu.CompilerParams(
            dimension_semantics=("parallel",)),   # batch tiles independent -> megacore on v7x
    )(x, w_or_r, w_and_r)


def gcln_cnf_arch3_reference(x, w_or, w_and, output_size, K):
    """Pure-JAX reference mirroring the PyTorch forward for verification."""
    inp = jnp.concatenate([x, 1.0 - x], axis=1)                                  # (B, 2F)
    w_or_c = jnp.clip(w_or, 0.0, 1.0)
    w_and_c = jnp.clip(w_and, 0.0, 1.0).reshape(-1)
    or_res = 1.0 - jnp.prod(1.0 - inp[:, :, None] * w_or_c[None, :, :], axis=1)  # (B, H)
    gated = w_and_c[None, :] * or_res + (1.0 - w_and_c[None, :])                 # (B, H)
    B = x.shape[0]
    return jnp.prod(gated.reshape(B, output_size, K), axis=-1)                   # (B, O)


if __name__ == "__main__":
    # Small shapes consistent with the module:
    #   nvars = 4  -> GCLN input_size = 2*nvars = 8
    #   num_of_output_var (output_size) = 4, K = 2 -> hidden = K*output_size = 8
    #   batch B = 8
    B, nvars, output_size, K = 8, 4, 4, 2
    input_size = 2 * nvars
    hidden = K * output_size

    key = jax.random.PRNGKey(0)
    kx, kor, kand = jax.random.split(key, 3)

    x = jax.random.uniform(kx, (B, nvars), dtype=jnp.float32)                 # inputs in [0, 1)
    w_or = jax.random.uniform(kor, (input_size, hidden), dtype=jnp.float32)   # ~U(0,1) init
    w_and = jax.random.uniform(kand, (hidden, 1), dtype=jnp.float32)          # ~U(0,1) init

    out = gcln_cnf_arch3_forward(x, w_or, w_and, output_size)
    out = jax.block_until_ready(out)

    ref = gcln_cnf_arch3_reference(x, w_or, w_and, output_size, K)
    assert out.shape == (B, output_size)
    assert jnp.allclose(out, ref, atol=1e-5, rtol=1e-5), (out, ref)

    print("KERNEL_OK")
</pallas_src>

<mosaic_0001>
module attributes {stable_mosaic.version = 11 : i64} {
  func.func @gcln_cnf_kernel(%arg0: i32, %arg1: memref<8x4xf32, #tpu.memory_space<vmem>>, %arg2: memref<8x8xf32, #tpu.memory_space<vmem>>, %arg3: memref<1x8xf32, #tpu.memory_space<vmem>>, %arg4: memref<8x4xf32, #tpu.memory_space<vmem>>) attributes {dimension_semantics = [#tpu.dimension_semantics<parallel>], iteration_bounds = array<i64: 1>, scalar_prefetch = 0 : i64, scratch_operands = 0 : i64, tpu.core_type = #tpu.core_type<tc>, window_params = [{transform_indices = @transform_0, window_bounds = array<i64: 8, 4>}, {pipeline_mode = #tpu.pipeline_mode<synchronous>, transform_indices = @transform_1, window_bounds = array<i64: 8, 8>}, {pipeline_mode = #tpu.pipeline_mode<synchronous>, transform_indices = @transform_2, window_bounds = array<i64: 1, 8>}, {transform_indices = @transform_3, window_bounds = array<i64: 8, 4>}]} {
    %c0 = arith.constant 0 : index
    %c0_0 = arith.constant 0 : index
    %0 = vector.load %arg1[%c0, %c0_0] : memref<8x4xf32, #tpu.memory_space<vmem>>, vector<8x4xf32>
    %c0_1 = arith.constant 0 : index
    %c0_2 = arith.constant 0 : index
    %1 = vector.load %arg2[%c0_1, %c0_2] : memref<8x8xf32, #tpu.memory_space<vmem>>, vector<8x8xf32>
    %cst = arith.constant 0.000000e+00 : f32
    %cst_3 = arith.constant 1.000000e+00 : f32
    %2 = vector.broadcast %cst : f32 to vector<8x8xf32>
    %3 = arith.maximumf %2, %1 : vector<8x8xf32>
    %4 = vector.broadcast %cst_3 : f32 to vector<8x8xf32>
    %5 = arith.minimumf %4, %3 : vector<8x8xf32>
    %c0_4 = arith.constant 0 : index
    %c0_5 = arith.constant 0 : index
    %6 = vector.load %arg3[%c0_4, %c0_5] : memref<1x8xf32, #tpu.memory_space<vmem>>, vector<1x8xf32>
    %cst_6 = arith.constant 0.000000e+00 : f32
    %cst_7 = arith.constant 1.000000e+00 : f32
    %7 = vector.broadcast %cst_6 : f32 to vector<1x8xf32>
    %8 = arith.maximumf %7, %6 : vector<1x8xf32>
    %9 = vector.broadcast %cst_7 : f32 to vector<1x8xf32>
    %10 = arith.minimumf %9, %8 : vector<1x8xf32>
    %11 = vector.extract_strided_slice %5 {offsets = [0, 0], sizes = [4, 8], strides = [1, 1]} : vector<8x8xf32> to vector<4x8xf32>
    %12 = vector.extract_strided_slice %5 {offsets = [4, 0], sizes = [4, 8], strides = [1, 1]} : vector<8x8xf32> to vector<4x8xf32>
    %cst_8 = arith.constant 1.000000e+00 : f32
    %13 = vector.broadcast %cst_8 : f32 to vector<8x8xf32>
    %14 = vector.shape_cast %0 : vector<8x4xf32> to vector<8x4x1xf32>
    %15 = vector.shape_cast %11 : vector<4x8xf32> to vector<1x4x8xf32>
    %16 = vector.broadcast %14 : vector<8x4x1xf32> to vector<8x4x8xf32>
    %17 = vector.broadcast %15 : vector<1x4x8xf32> to vector<8x4x8xf32>
    %18 = arith.mulf %16, %17 : vector<8x4x8xf32>
    %cst_9 = arith.constant 1.000000e+00 : f32
    %19 = vector.broadcast %cst_9 : f32 to vector<8x4x8xf32>
    %20 = arith.subf %19, %18 : vector<8x4x8xf32>
    %cst_10 = arith.constant 1.000000e+00 : f32
    %21 = vector.broadcast %cst_10 : f32 to vector<8x4x1xf32>
    %22 = arith.subf %21, %14 : vector<8x4x1xf32>
    %23 = vector.shape_cast %12 : vector<4x8xf32> to vector<1x4x8xf32>
    %24 = vector.broadcast %22 : vector<8x4x1xf32> to vector<8x4x8xf32>
    %25 = vector.broadcast %23 : vector<1x4x8xf32> to vector<8x4x8xf32>
    %26 = arith.mulf %24, %25 : vector<8x4x8xf32>
    %cst_11 = arith.constant 1.000000e+00 : f32
    %27 = vector.broadcast %cst_11 : f32 to vector<8x4x8xf32>
    %28 = arith.subf %27, %26 : vector<8x4x8xf32>
    %29 = arith.mulf %20, %28 : vector<8x4x8xf32>
    %30 = vector.extract_strided_slice %29 {offsets = [0, 0, 0], sizes = [8, 2, 8], strides = [1, 1, 1]} : vector<8x4x8xf32> to vector<8x2x8xf32>
    %31 = vector.extract_strided_slice %29 {offsets = [0, 2, 0], sizes = [8, 2, 8], strides = [1, 1, 1]} : vector<8x4x8xf32> to vector<8x2x8xf32>
    %32 = arith.mulf %30, %31 : vector<8x2x8xf32>
    %33 = vector.extract_strided_slice %32 {offsets = [0, 0, 0], sizes = [8, 1, 8], strides = [1, 1, 1]} : vector<8x2x8xf32> to vector<8x1x8xf32>
    %34 = vector.extract_strided_slice %32 {offsets = [0, 1, 0], sizes = [8, 1, 8], strides = [1, 1, 1]} : vector<8x2x8xf32> to vector<8x1x8xf32>
    %35 = arith.mulf %33, %34 : vector<8x1x8xf32>
    %36 = vector.shape_cast %35 : vector<8x1x8xf32> to vector<8x8xf32>
    %37 = arith.mulf %13, %36 : vector<8x8xf32>
    %cst_12 = arith.constant 1.000000e+00 : f32
    %38 = vector.broadcast %cst_12 : f32 to vector<8x8xf32>
    %39 = arith.subf %38, %37 : vector<8x8xf32>
    %40 = vector.broadcast %10 : vector<1x8xf32> to vector<8x8xf32>
    %41 = arith.mulf %40, %39 : vector<8x8xf32>
    %cst_13 = arith.constant 1.000000e+00 : f32
    %42 = vector.broadcast %cst_13 : f32 to vector<1x8xf32>
    %43 = arith.subf %42, %10 : vector<1x8xf32>
    %44 = vector.broadcast %43 : vector<1x8xf32> to vector<8x8xf32>
    %45 = arith.addf %41, %44 : vector<8x8xf32>
    %46 = vector.extract_strided_slice %45 {offsets = [0, 0], sizes = [8, 4], strides = [1, 1]} : vector<8x8xf32> to vector<8x4xf32>
    %47 = vector.extract_strided_slice %45 {offsets = [0, 4], sizes = [8, 4], strides = [1, 1]} : vector<8x8xf32> to vector<8x4xf32>
    %48 = arith.mulf %46, %47 : vector<8x4xf32>
    %c0_14 = arith.constant 0 : index
    %c0_15 = arith.constant 0 : index
    %49 = vector.load %arg4[%c0_14, %c0_15] : memref<8x4xf32, #tpu.memory_space<vmem>>, vector<8x4xf32>
    tpu.vector_store %arg4[%c0_14, %c0_15], %48 {strides = array<i32>} : memref<8x4xf32, #tpu.memory_space<vmem>>, vector<8x4xf32>,
    return
  }
  func.func @transform_0(%arg0: i32) -> (i32, i32) {
    %c0_i32 = arith.constant 0 : i32
    %c0_i32_0 = arith.constant 0 : i32
    return %arg0, %c0_i32 : i32, i32
  }
  func.func @transform_1(%arg0: i32) -> (i32, i32) {
    %c0_i32 = arith.constant 0 : i32
    %c0_i32_0 = arith.constant 0 : i32
    %c0_i32_1 = arith.constant 0 : i32
    return %c0_i32, %c0_i32_0 : i32, i32
  }
  func.func @transform_2(%arg0: i32) -> (i32, i32) {
    %c0_i32 = arith.constant 0 : i32
    %c0_i32_0 = arith.constant 0 : i32
    %c0_i32_1 = arith.constant 0 : i32
    return %c0_i32, %c0_i32_0 : i32, i32
  }
  func.func @transform_3(%arg0: i32) -> (i32, i32) {
    %c0_i32 = arith.constant 0 : i32
    %c0_i32_0 = arith.constant 0 : i32
    return %arg0, %c0_i32 : i32, i32
  }
}

</mosaic_0001>

<bundles_post_ra>
// kernel: tpu_custom_call.1
= control target key start
LH: loop header
LB: loop body
LE: loop exit
PB: predicated region body
PF: predicated region fallthrough
CT: control target
= control target key end

     0   :  { %v21_v0 = vlaneseq  ;;  %vm215_vm0 = vcmask 1041409   ;;  %vm218_vm1 = vcmask 1042434   ;;  %vm221_vm2 = vcmask 1043459   ;;  %s305_s0 = inlined_call_operand.vmem [shape: f32[8,4], index: 0, kind: input, shape index: {}]   ;;  %s306_s1 = inlined_call_operand.vmem [shape: f32[8,8], index: 1, kind: input, shape index: {}]   ;;  %s307_s2 = inlined_call_operand.vmem [shape: f32[1,8], index: 2, kind: input, shape index: {}]   ;;  %s308_s3 = inlined_call_operand.vmem [shape: f32[8,4], index: 3, kind: output, shape index: {}]  }
   0x1   :  { %v14_v2 = vld [vmem:[%s305_s0] sm:$0xff]  ;;  %vm224_vm3 = vcmask 1044484   ;;  %vm227_vm4 = vcmask 1045509   ;;  %vm230_vm5 = vcmask 1046534   ;;  %vm233_vm6 = vcmask 1047559  }
   0x2   :  { %v22_v1 = vshrl.u32 %v21_v0, 7  ;;  %v15_v19 = vld [vmem:[%s306_s1] sm:$0xff]  ;;  %vm250_vm7 = vcmask 31744  }
   0x3   :  { %v16_v20 = vmax.f32 %v15_v19, 0.0 }
   0x4   :  { %v30_v3 = vsub.s32 1, %v22_v1  ;;  %v281_v4 = vsub.s32 0, %v22_v1  ;;  %v37_v5 = vsub.s32 2, %v22_v1  ;;  %v44_v6 = vsub.s32 3, %v22_v1 }
   0x5   :  { %v51_v11 = vsub.s32 4, %v22_v1  ;;  %v58_v12 = vsub.s32 5, %v22_v1  ;;  %v65_v15 = vsub.s32 6, %v22_v1  ;;  %v72_v16 = vsub.s32 7, %v22_v1 }
   0x6   :  { %v31_v7 = vrot.slane %v14_v2, %v30_v3  ;;  %v24_v8 = vrot.slane %v14_v2, %v281_v4  ;;  %v38_v9 = vrot.slane %v14_v2, %v37_v5  ;;  %v45_v10 = vrot.slane %v14_v2, %v44_v6 }
   0x7   :  { %v52_v13 = vrot.slane %v14_v2, %v51_v11  ;;  %v59_v14 = vrot.slane %v14_v2, %v58_v12  ;;  %v66_v17 = vrot.slane %v14_v2, %v65_v15  ;;  %v73_v18 = vrot.slane %v14_v2, %v72_v16 }
   0x8   :  { %33 = vbcast.lane.b32.xlu0 %v31_v7, 256  ;;  %26 = vbcast.lane.b32.xlu1 %v24_v8, 256  ;;  %v17_v21 = vmin.f32 %v16_v20, 1.0 }
   0xa   :  { %v287_v22 = vrot.slane %v17_v21, 4 }
   0xc   :  { %40 = vbcast.lane.b32.xlu0 %v38_v9, 256  ;;  %47 = vbcast.lane.b32.xlu1 %v45_v10, 256 }
  0x10   :  { %54 = vbcast.lane.b32.xlu0 %v52_v13, 256  ;;  %61 = vbcast.lane.b32.xlu1 %v59_v14, 256 }
  0x14   :  { %68 = vbcast.lane.b32.xlu0 %v66_v17, 256  ;;  %75 = vbcast.lane.b32.xlu1 %v73_v18, 256 }
  0x7a   :  { %v34_v23 = vpop.permute.xlu0 %33  ;;  %v27_v24 = vpop.permute.xlu1 %26 }
  0x7b   :  { %v78_v25 = vmul.f32 %v34_v23, %v17_v21  ;;  %v94_v26 = vsub.f32 1.0, %v34_v23  ;;  %v77_v27 = vmul.f32 %v27_v24, %v17_v21  ;;  %v93_v28 = vsub.f32 1.0, %v27_v24 }
  0x7d   :  { %v105_v29 = vmul.f32 %v287_v22, %v94_v26  ;;  %v85_v30 = vsub.f32 1.0, %v77_v27  ;;  %v104_v31 = vmul.f32 %v287_v22, %v93_v28  ;;  %v86_v32 = vsub.f32 1.0, %v78_v25 }
  0x7e   :  { %v41_v33 = vpop.permute.xlu0 %40  ;;  %v48_v34 = vpop.permute.xlu1 %47 }
  0x7f   :  { %v113_v35 = vsub.f32 1.0, %v105_v29  ;;  %v112_v36 = vsub.f32 1.0, %v104_v31  ;;  %v79_v37 = vmul.f32 %v41_v33, %v17_v21  ;;  %v95_v38 = vsub.f32 1.0, %v41_v33 }
  0x80   :  { %v80_v39 = vmul.f32 %v48_v34, %v17_v21  ;;  %v96_v40 = vsub.f32 1.0, %v48_v34 }
  0x81   :  { %v121_v41 = vmul.f32 %v113_v35, %v86_v32  ;;  %v120_v42 = vmul.f32 %v112_v36, %v85_v30  ;;  %v106_v43 = vmul.f32 %v287_v22, %v95_v38  ;;  %v87_v44 = vsub.f32 1.0, %v79_v37 }
  0x82   :  { %v88_v45 = vsub.f32 1.0, %v80_v39  ;;  %v107_v46 = vmul.f32 %v287_v22, %v96_v40  ;;  %v55_v47 = vpop.permute.xlu0 %54  ;;  %v62_v48 = vpop.permute.xlu1 %61 }
  0x83   :  { %v137_v49 = vrot.slane %v121_v41, 2  ;;  %v136_v50 = vrot.slane %v120_v42, 2  ;;  %v114_v51 = vsub.f32 1.0, %v106_v43  ;;  %v81_v52 = vmul.f32 %v55_v47, %v17_v21  ;;  %v18_v43 = vld [vmem:[%s307_s2] sm:$0x1]  ;;  %s257_s2 = smov 124  }
  0x84   :  { %v115_v53 = vsub.f32 1.0, %v107_v46  ;;  %v97_v54 = vsub.f32 1.0, %v55_v47  ;;  %v82_v55 = vmul.f32 %v62_v48, %v17_v21  ;;  %v98_v56 = vsub.f32 1.0, %v62_v48 }
  0x85   :  { %v153_v57 = vmul.f32 %v137_v49, %v121_v41  ;;  %v152_v58 = vmul.f32 %v136_v50, %v120_v42  ;;  %v122_v59 = vmul.f32 %v114_v51, %v87_v44  ;;  %v89_v3 = vsub.f32 1.0, %v81_v52 }
  0x86   :  { %v123_v60 = vmul.f32 %v115_v53, %v88_v45  ;;  %v108_v61 = vmul.f32 %v287_v22, %v97_v54  ;;  %v90_v62 = vsub.f32 1.0, %v82_v55  ;;  %v109_v63 = vmul.f32 %v287_v22, %v98_v56  ;;  %v69_v0 = vpop.permute.xlu0 %68  ;;  %v76_v10 = vpop.permute.xlu1 %75 }
  0x87   :  { %v169_v1 = vrot.slane %v153_v57, 1  ;;  %v138_v2 = vrot.slane %v122_v59, 2  ;;  %v83_v5 = vmul.f32 %v69_v0, %v17_v21  ;;  %v99_v9 = vsub.f32 1.0, %v69_v0 }
  0x88   :  { %v139_v6 = vrot.slane %v123_v60, 2  ;;  %v116_v7 = vsub.f32 1.0, %v108_v61  ;;  %v117_v8 = vsub.f32 1.0, %v109_v63  ;;  %v168_v17 = vrot.slane %v152_v58, 1 }
  0x89   :  { %v185_v11 = vmul.f32 %v169_v1, %v153_v57  ;;  %v154_v12 = vmul.f32 %v138_v2, %v122_v59  ;;  %v110_v16 = vmul.f32 %v287_v22, %v99_v9  ;;  %v91_v19 = vsub.f32 1.0, %v83_v5 }
  0x8a   :  { %v155_v13 = vmul.f32 %v139_v6, %v123_v60  ;;  %v124_v14 = vmul.f32 %v116_v7, %v89_v3  ;;  %v125_v15 = vmul.f32 %v117_v8, %v90_v62  ;;  %v84_v20 = vmul.f32 %v76_v10, %v17_v21 }
  0x8b   :  { %v170_v18 = vrot.slane %v154_v12, 1  ;;  %v118_v26 = vsub.f32 1.0, %v110_v16  ;;  %v193_v27 = vsub.f32 1.0, %v185_v11  ;;  %v100_v29 = vsub.f32 1.0, %v76_v10 }
  0x8c   :  { %v171_v23 = vrot.slane %v155_v13, 1  ;;  %v140_v24 = vrot.slane %v124_v14, 2  ;;  %v141_v25 = vrot.slane %v125_v15, 2  ;;  %v184_v34 = vmul.f32 %v168_v17, %v152_v58 }
  0x8d   :  { %v186_v28 = vmul.f32 %v170_v18, %v154_v12  ;;  %v126_v33 = vmul.f32 %v118_v26, %v91_v19  ;;  %v92_v36 = vsub.f32 1.0, %v84_v20  ;;  %v111_v37 = vmul.f32 %v287_v22, %v100_v29 }
  0x8e   :  { %v187_v30 = vmul.f32 %v171_v23, %v155_v13  ;;  %v156_v31 = vmul.f32 %v140_v24, %v124_v14  ;;  %v157_v32 = vmul.f32 %v141_v25, %v125_v15  ;;  %v214_v21 = vrot.slane %v193_v27, 7 }
  0x8f   :  { %v194_v35 = vsub.f32 1.0, %v186_v28  ;;  %v142_v40 = vrot.slane %v126_v33, 2  ;;  %v119_v42 = vsub.f32 1.0, %v111_v37  ;;  %v192_v48 = vsub.f32 1.0, %v184_v34 }
  0x90   :  { %v172_v38 = vrot.slane %v156_v31, 1  ;;  %v173_v39 = vrot.slane %v157_v32, 1  ;;  %v195_v41 = vsub.f32 1.0, %v187_v30  ;;  %v19_v51 = vmax.f32 %v18_v43, 0.0 }
  0x91   :  { %v217_v44 = vrot.slane %v194_v35, 6  ;;  %v158_v47 = vmul.f32 %v142_v40, %v126_v33  ;;  %v127_v49 = vmul.f32 %v119_v42, %v92_v36  ;;  %v216_v52 = vsel %vm215_vm0, %v214_v21, %v192_v48 }
  0x92   :  { %v188_v45 = vmul.f32 %v172_v38, %v156_v31  ;;  %v189_v46 = vmul.f32 %v173_v39, %v157_v32  ;;  %v220_v53 = vrot.slane %v195_v41, 5  ;;  %v20_v61 = vmin.f32 %v19_v51, 1.0 }
  0x93   :  { %v174_v22 = vrot.slane %v158_v47, 1  ;;  %v143_v55 = vrot.slane %v127_v49, 2  ;;  %v219_v56 = vsel %vm218_vm1, %v217_v44, %v216_v52 }
  0x94   :  { %v196_v50 = vsub.f32 1.0, %v188_v45  ;;  %v197_v54 = vsub.f32 1.0, %v189_v46  ;;  %v222_v62 = vsel %vm221_vm2, %v220_v53, %v219_v56  ;;  %v237_v5 = vsub.f32 1.0, %v20_v61 }
  0x95   :  { %v190_v58 = vmul.f32 %v174_v22, %v158_v47  ;;  %v159_v59 = vmul.f32 %v143_v55, %v127_v49  ;;  %v204_v8 = vrot.slane %v20_v61, %v281_v4 }
  0x96   :  { %v223_v57 = vrot.slane %v196_v50, 4  ;;  %v226_v63 = vrot.slane %v197_v54, 3  ;;  %v242_v11 = vrot.slane %v237_v5, %v281_v4 }
  0x97   :  { %v198_v60 = vsub.f32 1.0, %v190_v58  ;;  %v175_v0 = vrot.slane %v159_v59, 1 }
  0x98   :  { %v225_v2 = vsel %vm224_vm3, %v223_v57, %v222_v62 }
  0x99   :  { %v229_v1 = vrot.slane %v198_v60, 2  ;;  %v191_v3 = vmul.f32 %v175_v0, %v159_v59  ;;  %v228_v7 = vsel %vm227_vm4, %v226_v63, %v225_v2 }
  0x9b   :  { %v199_v6 = vsub.f32 1.0, %v191_v3  ;;  %v231_v9 = vsel %vm230_vm5, %v229_v1, %v228_v7 }
  0x9d   :  { %v232_v10 = vrot.slane %v199_v6, 1 }
  0x9f   :  { %v234_v12 = vsel %vm233_vm6, %v232_v10, %v231_v9 }
  0xa0   :  { %v236_v13 = vmul.f32 %v234_v12, %v204_v8 }
  0xa2   :  { %v244_v14 = vadd.f32 %v242_v11, %v236_v13 }
  0xa4   :  { %246 = vrot.lane.b32.xlu0 %v244_v14, %s257_s2 }
 0x116   :  { %v247_v15 = vpop.permute.xlu0 %246 }
 0x117   :  { %v249_v16 = vmul.f32 %v247_v15, %v244_v14 }
 0x119   :  { %251 = vst.msk [vmem:[%s308_s3] sm:$0xff] %vm250_vm7, %v249_v16 }

</bundles_post_ra>
